<compile_context>
chip_gen: v7x
topology: tpu7x:2x2x1
jax: 0.10.0
libtpu: 0.0.40
codegen_flags: <defaults>
</compile_context>

<pallas_src>
import functools

import jax
import jax.numpy as jnp
from jax.experimental import pallas as pl
from jax.experimental.pallas import tpu as pltpu

LANES = 128
SUB = 8
# 8192 rows x 128 lanes x 4B = 4 MiB per input per pipeline buffer -> 16 MiB of
# double-buffered input working set (f32).  Amortizes the ~0.35us per-grid-step
# overhead to a few percent on every generation while staying well inside the
# 40 MiB scoped-VMEM limit requested below (v7x physical VMEM is 64 MiB / TC).
MAX_BLOCK_ROWS = 8192
# In-kernel accumulation chunk: bounds the per-iteration f32 intermediate
# footprint (~256 KiB) independently of block_rows.
CHUNK_ROWS = 512


def _round_up(v, m):
    return ((v + m - 1) // m) * m


def _focal_terms(x, t, alpha, gamma):
    """Elementwise focal loss in f32 (numerically stable BCE with logits)."""
    bce = jnp.maximum(x, 0.0) - x * t + jnp.log1p(jnp.exp(-jnp.abs(x)))
    pt = jnp.exp(-bce)
    one_m = 1.0 - pt
    if gamma == 2.0:                       # module default: avoid float pow
        w = one_m * one_m
    elif gamma == 1.0:
        w = one_m
    elif gamma == 0.0:
        w = jnp.ones_like(one_m)
    else:
        w = one_m ** gamma
    return alpha * w * bce


def _focal_kernel(x_ref, t_ref, out_ref, *, alpha, gamma, block_rows,
                  chunk_rows, num_full_chunks, rem_rows, valid_rows,
                  need_mask):
    base_row = pl.program_id(0) * block_rows

    def chunk_sum(r0, nrows, masked):
        x = x_ref[pl.ds(r0, nrows), :].astype(jnp.float32)
        t = t_ref[pl.ds(r0, nrows), :].astype(jnp.float32)
        fl = _focal_terms(x, t, alpha, gamma)
        if masked:
            # Rows at/after `valid_rows` are out-of-bounds reads (undefined
            # data, possibly NaN/Inf) from the ragged last block: discard them
            # with a lane select (NOT fl * mask, which would propagate NaN).
            row = (jax.lax.broadcasted_iota(jnp.int32, fl.shape, 0)
                   + base_row + r0)
            fl = jnp.where(row < valid_rows, fl, 0.0)
        # Sublane-aligned (nrows,128)->(nrows//8,8,128) view; summing the
        # leading axis is pure vreg-wise VPU adds.
        return jnp.sum(fl.reshape(-1, SUB, LANES), axis=0)

    def accumulate(masked):
        acc = jnp.zeros((SUB, LANES), jnp.float32)
        if num_full_chunks > 0:
            def chunk_step(c, a):
                r0 = pl.multiple_of(c * chunk_rows, chunk_rows)
                return a + chunk_sum(r0, chunk_rows, masked)
            acc = jax.lax.fori_loop(0, num_full_chunks, chunk_step, acc)
        if rem_rows > 0:  # static remainder chunk (block_rows % chunk_rows)
            acc = acc + chunk_sum(num_full_chunks * chunk_rows, rem_rows,
                                  masked)
        out_ref[...] = acc

    if need_mask:
        last = pl.num_programs(0) - 1

        @pl.when(pl.program_id(0) == last)
        def _():
            accumulate(masked=True)

        @pl.when(pl.program_id(0) != last)
        def _():
            accumulate(masked=False)
    else:
        accumulate(masked=False)


def focal_loss(inputs, targets, *, weight=None, alpha=0.25, gamma=2.0,
               reduction="mean"):
    if weight is not None:
        # TODO(synk): elementwise BCE weight not implemented (module default
        # is weight=None).
        raise NotImplementedError
    if reduction not in ("mean", "sum"):
        # TODO(synk): reduction='none' elementwise output path not wired up.
        raise NotImplementedError

    alpha = float(alpha)
    gamma = float(gamma)
    n = inputs.size
    x = inputs.reshape(-1)
    t = targets.reshape(-1)

    n_main = (n // LANES) * LANES
    rows = n_main // LANES

    total = jnp.float32(0.0)

    if rows > 0:
        x_main = x[:n_main].reshape(rows, LANES)   # no-op slice when aligned
        t_main = t[:n_main].reshape(rows, LANES)

        # Largest block that fits the budget, but guarantee >= 2 grid blocks
        # once there is enough work so the 'parallel' axis actually feeds both
        # v7x TensorCores (neutral on single-TC v5e/v6e).
        block_rows = _round_up(rows, SUB)
        if rows >= 2 * CHUNK_ROWS:
            block_rows = min(block_rows, _round_up(pl.cdiv(rows, 2), SUB))
        block_rows = min(block_rows, MAX_BLOCK_ROWS)

        chunk_rows = min(CHUNK_ROWS, block_rows)
        num_full_chunks = block_rows // chunk_rows
        rem_rows = block_rows - num_full_chunks * chunk_rows  # multiple of 8

        num_blocks = pl.cdiv(rows, block_rows)
        need_mask = (rows % block_rows) != 0

        kernel = functools.partial(
            _focal_kernel, alpha=alpha, gamma=gamma, block_rows=block_rows,
            chunk_rows=chunk_rows, num_full_chunks=num_full_chunks,
            rem_rows=rem_rows, valid_rows=rows, need_mask=need_mask)

        partials = pl.pallas_call(
            kernel,
            out_shape=jax.ShapeDtypeStruct((num_blocks, SUB, LANES),
                                           jnp.float32),
            grid_spec=pltpu.PrefetchScalarGridSpec(
                num_scalar_prefetch=0,
                grid=(num_blocks,),
                in_specs=[
                    pl.BlockSpec((block_rows, LANES), lambda i: (i, 0)),
                    pl.BlockSpec((block_rows, LANES), lambda i: (i, 0)),
                ],
                # Leading dim squeezed: kernel writes an (8,128) partial.
                out_specs=pl.BlockSpec((None, SUB, LANES),
                                       lambda i: (i, 0, 0)),
            ),
            compiler_params=pltpu.CompilerParams(
                dimension_semantics=("parallel",),
                vmem_limit_bytes=40 << 20),
        )(x_main, t_main)

        total = total + jnp.sum(partials)

    if n_main < n:
        # <128-element lane tail: negligible, handled in plain JAX instead of
        # paying a full-array jnp.pad copy before the kernel.
        x_tail = x[n_main:].astype(jnp.float32)
        t_tail = t[n_main:].astype(jnp.float32)
        total = total + jnp.sum(_focal_terms(x_tail, t_tail, alpha, gamma))

    if reduction == "mean":
        return total / jnp.float32(n)
    return total  # 'sum'


def _focal_loss_ref(inputs, targets, alpha=0.25, gamma=2.0, reduction="mean"):
    x = inputs.astype(jnp.float32)
    t = targets.astype(jnp.float32)
    bce = jnp.maximum(x, 0.0) - x * t + jnp.log1p(jnp.exp(-jnp.abs(x)))
    pt = jnp.exp(-bce)
    fl = alpha * (1.0 - pt) ** gamma * bce
    return jnp.mean(fl) if reduction == "mean" else jnp.sum(fl)


if __name__ == "__main__":
    key = jax.random.PRNGKey(0)
    k1, k2, k3, k4 = jax.random.split(key, 4)

    # Small NCHW-like logits / binary targets (segmentation-style focal loss).
    x = jax.random.normal(k1, (2, 4, 16, 16), dtype=jnp.float32) * 2.0
    t = (jax.random.uniform(k2, (2, 4, 16, 16)) > 0.5).astype(jnp.float32)

    out = jax.block_until_ready(
        focal_loss(x, t, alpha=0.25, gamma=2.0, reduction="mean"))
    ref = _focal_loss_ref(x, t)
    assert jnp.allclose(out, ref, rtol=1e-5, atol=1e-6), (out, ref)

    # Ragged case: exercises in-kernel last-block masking + lane-tail epilogue.
    x2 = jax.random.normal(k3, (3, 5, 17, 13), dtype=jnp.float32) * 2.0
    t2 = (jax.random.uniform(k4, (3, 5, 17, 13)) > 0.5).astype(jnp.float32)
    out2 = jax.block_until_ready(
        focal_loss(x2, t2, alpha=0.25, gamma=2.0, reduction="sum"))
    ref2 = _focal_loss_ref(x2, t2, reduction="sum")
    assert jnp.allclose(out2, ref2, rtol=1e-5, atol=1e-5), (out2, ref2)

    print("KERNEL_OK")
</pallas_src>

<mosaic_0001>
module attributes {stable_mosaic.version = 11 : i64} {
  func.func @_focal_kernel(%arg0: i32, %arg1: memref<16x128xf32, #tpu.memory_space<vmem>>, %arg2: memref<16x128xf32, #tpu.memory_space<vmem>>, %arg3: memref<1x8x128xf32, #tpu.memory_space<vmem>>) attributes {dimension_semantics = [#tpu.dimension_semantics<parallel>], iteration_bounds = array<i64: 1>, scalar_prefetch = 0 : i64, scratch_operands = 0 : i64, tpu.core_type = #tpu.core_type<tc>, window_params = [{transform_indices = @transform_0, window_bounds = array<i64: 16, 128>}, {transform_indices = @transform_1, window_bounds = array<i64: 16, 128>}, {transform_indices = @transform_2, window_bounds = array<i64: 1, 8, 128>}]} {
    %cst = arith.constant 0.000000e+00 : f32
    %0 = vector.broadcast %cst : f32 to vector<8x128xf32>
    %c0_i32 = arith.constant 0 : i32
    %c16_i32 = arith.constant 16 : i32
    %1 = arith.muli %c0_i32, %c16_i32 : i32
    %2 = tpu.assume_multiple %1, 16 : i32
    %3 = arith.index_cast %2 : i32 to index
    %c0 = arith.constant 0 : index
    %4 = vector.load %arg1[%3, %c0] : memref<16x128xf32, #tpu.memory_space<vmem>>, vector<16x128xf32>
    %5 = arith.index_cast %2 : i32 to index
    %c0_0 = arith.constant 0 : index
    %6 = vector.load %arg2[%5, %c0_0] : memref<16x128xf32, #tpu.memory_space<vmem>>, vector<16x128xf32>
    %cst_1 = arith.constant 0.000000e+00 : f32
    %7 = vector.broadcast %cst_1 : f32 to vector<16x128xf32>
    %8 = arith.maximumf %4, %7 : vector<16x128xf32>
    %9 = arith.mulf %4, %6 : vector<16x128xf32>
    %10 = arith.subf %8, %9 : vector<16x128xf32>
    %11 = math.absf %4 : vector<16x128xf32>
    %cst_2 = arith.constant 0.000000e+00 : f32
    %12 = vector.broadcast %cst_2 : f32 to vector<16x128xf32>
    %13 = arith.subf %12, %11 : vector<16x128xf32>
    %14 = math.exp %13 : vector<16x128xf32>
    %15 = math.log1p %14 : vector<16x128xf32>
    %16 = arith.addf %10, %15 : vector<16x128xf32>
    %cst_3 = arith.constant 0.000000e+00 : f32
    %17 = vector.broadcast %cst_3 : f32 to vector<16x128xf32>
    %18 = arith.subf %17, %16 : vector<16x128xf32>
    %19 = math.exp %18 : vector<16x128xf32>
    %cst_4 = arith.constant 1.000000e+00 : f32
    %20 = vector.broadcast %cst_4 : f32 to vector<16x128xf32>
    %21 = arith.subf %20, %19 : vector<16x128xf32>
    %22 = arith.mulf %21, %21 : vector<16x128xf32>
    %cst_5 = arith.constant 2.500000e-01 : f32
    %23 = vector.broadcast %cst_5 : f32 to vector<16x128xf32>
    %24 = arith.mulf %23, %22 : vector<16x128xf32>
    %25 = arith.mulf %24, %16 : vector<16x128xf32>
    %26 = vector.shape_cast %25 : vector<16x128xf32> to vector<2x8x128xf32>
    %cst_6 = arith.constant dense<0.000000e+00> : vector<8x128xf32>
    %27 = vector.multi_reduction <add>, %26, %cst_6 [0] : vector<2x8x128xf32> to vector<8x128xf32>
    %28 = arith.addf %0, %27 : vector<8x128xf32>
    %c1_i32 = arith.constant 1 : i32
    %c0_7 = arith.constant 0 : index
    %c0_8 = arith.constant 0 : index
    %c0_9 = arith.constant 0 : index
    %29 = vector.load %arg3[%c0_7, %c0_8, %c0_9] : memref<1x8x128xf32, #tpu.memory_space<vmem>>, vector<1x8x128xf32>
    %30 = vector.shape_cast %29 : vector<1x8x128xf32> to vector<8x128xf32>
    %31 = vector.shape_cast %28 : vector<8x128xf32> to vector<1x8x128xf32>
    tpu.vector_store %arg3[%c0_7, %c0_8, %c0_9], %31 {strides = array<i32>} : memref<1x8x128xf32, #tpu.memory_space<vmem>>, vector<1x8x128xf32>,
    return
  }
  func.func @transform_0(%arg0: i32) -> (i32, i32) {
    %c0_i32 = arith.constant 0 : i32
    %c0_i32_0 = arith.constant 0 : i32
    return %arg0, %c0_i32 : i32, i32
  }
  func.func @transform_1(%arg0: i32) -> (i32, i32) {
    %c0_i32 = arith.constant 0 : i32
    %c0_i32_0 = arith.constant 0 : i32
    return %arg0, %c0_i32 : i32, i32
  }
  func.func @transform_2(%arg0: i32) -> (i32, i32, i32) {
    %c0_i32 = arith.constant 0 : i32
    %c0_i32_0 = arith.constant 0 : i32
    %c0_i32_1 = arith.constant 0 : i32
    return %arg0, %c0_i32, %c0_i32_0 : i32, i32, i32
  }
}

</mosaic_0001>

<bundles_post_ra>
// kernel: tpu_custom_call.1
= control target key start
LH: loop header
LB: loop body
LE: loop exit
PB: predicated region body
PF: predicated region fallthrough
CT: control target
= control target key end

     0   :  { %7 = vsyncpa [#allocation3], 0  ;;  %s256_s0 = inlined_call_operand.hbm [shape: f32[16,128], index: 0, kind: input, shape index: {}]   ;;  %s257_s1 = inlined_call_operand.hbm [shape: f32[16,128], index: 1, kind: input, shape index: {}]   ;;  %s258_s2 = inlined_call_operand.hbm [shape: f32[1,8,128], index: 2, kind: output, shape index: {}]  }
   0x1   :  { %8 = vsyncpa [#allocation6], 0 }
   0x2   :  { %9 = vsyncpa [#allocation4], 0  ;;  %s200_s9 = smov [#allocation2]   ;;  %s128_s13 = scalar_lea.hbm %s256_s0, 256 }
   0x3   :  { %s15_s10 = sshll.u32 %s200_s9, 4  ;;  %p129_p0 = scmp.ne.s32.totalorder %s256_s0, %s128_s13  ;;  %s16_s10 = int_to_ptr.vmem [resolvable:$true] %s15_s10 }
   0x4   :  { %p132_p1 = scmp.lt.u32.totalorder %s128_s13, %s256_s0 }
   0x6   :  { %p134_p2 = pnand %p132_p1, %p129_p0 }
   0x8   :  { %137 = shalt.err (!%p134_p2)
}
   0x9   :  { %s138_s18 = scalar_lea.vmem %s16_s10, 256  ;;  %p143_p4 = scmp.lt.s32.totalorder %s16_s10, %s16_s10 }
   0xa   :  { %p139_p3 = scmp.ne.s32.totalorder %s16_s10, %s138_s18  ;;  %p144_p5 = scmp.lt.s32.totalorder %s138_s18, %s138_s18 }
   0xc   :  { %p145_p6 = por %p144_p5, %p143_p4 }
   0xe   :  { %p146_p7 = pnand %p145_p6, %p139_p3 }
  0x10   :  { %149 = shalt.err (!%p146_p7)
}
  0x11   :  { %s201_s19 = smov 128   ;;  %s202_s20 = smov 8  }
  0x12   :  { %21 = dma.hbm_to_vmem [thread:$0]  %s256_s0, 256, %s16_s10, [#allocation3], %s201_s19, %s201_s19, %s202_s20  }
  0x13   :  { %s203_s23 = smov [#allocation5]   ;;  %s150_s27 = scalar_lea.hbm %s257_s1, 256 }
  0x14   :  { %s27_s24 = sshll.u32 %s203_s23, 4  ;;  %p151_p8 = scmp.ne.s32.totalorder %s257_s1, %s150_s27  ;;  %s28_s24 = int_to_ptr.vmem [resolvable:$true] %s27_s24 }
  0x15   :  { %p154_p9 = scmp.lt.u32.totalorder %s150_s27, %s257_s1 }
  0x17   :  { %p156_p10 = pnand %p154_p9, %p151_p8 }
  0x19   :  { %159 = shalt.err (!%p156_p10)
}
  0x1a   :  { %s160_s4 = scalar_lea.vmem %s28_s24, 256  ;;  %p165_p12 = scmp.lt.s32.totalorder %s28_s24, %s28_s24 }
  0x1b   :  { %p161_p11 = scmp.ne.s32.totalorder %s28_s24, %s160_s4  ;;  %p166_p13 = scmp.lt.s32.totalorder %s160_s4, %s160_s4 }
  0x1d   :  { %p167_p0 = por %p166_p13, %p165_p12 }
  0x1f   :  { %p168_p1 = pnand %p167_p0, %p161_p11 }
  0x21   :  { %171 = shalt.err (!%p168_p1)
}
  0x22   :  { %33 = dma.hbm_to_vmem [thread:$0]  %s257_s1, 256, %s28_s24, [#allocation6], %s201_s19, %s201_s19, %s202_s20  }
  0x23   :  { %194 = dma.done.wait [#allocation3], 256  }
  0x24   :  { %195 = vsyncadd [#allocation3], 4294967040 }
  0x25   :  { %196 = dma.done.wait [#allocation6], 256  }
  0x26   :  { %197 = vsyncadd [#allocation6], 4294967040  ;;  %v40_v0 = vld [vmem:[#allocation2] sm:$0xff]  ;;  %v41_v1 = vld [vmem:[#allocation2 + $0x8] sm:$0xff]  ;;  %s204_s1 = smov [#allocation7]  }
  0x27   :  { %v50_v2 = vand.u32 2147483647, %v40_v0  ;;  %v51_v3 = vand.u32 2147483647, %v41_v1  ;;  %v42_v14 = vld [vmem:[#allocation5] sm:$0xff]  ;;  %v43_v15 = vld [vmem:[#allocation5 + $0x8] sm:$0xff] }
  0x28   :  { %v44_v17 = vmax.f32 %v40_v0, 0.0  ;;  %v46_v18 = vmul.f32 %v42_v14, %v40_v0  ;;  %v45_v21 = vmax.f32 %v41_v1, 0.0  ;;  %v47_v22 = vmul.f32 %v43_v15, %v41_v1  ;;  %s101_s6 = sshll.u32 %s204_s1, 4  ;;  %s102_s6 = int_to_ptr.vmem [resolvable:$true] %s101_s6 }
  0x29   :  { %v52_v4 = vsub.f32 0.0, %v50_v2  ;;  %v53_v5 = vsub.f32 0.0, %v51_v3  ;;  %s172_s7 = scalar_lea.vmem %s102_s6, 128  ;;  %p177_p3 = scmp.lt.s32.totalorder %s102_s6, %s102_s6 }
  0x2a   :  { %v48_v26 = vsub.f32 %v44_v17, %v46_v18  ;;  %v49_v29 = vsub.f32 %v45_v21, %v47_v22  ;;  %p173_p2 = scmp.ne.s32.totalorder %s102_s6, %s172_s7  ;;  %p178_p4 = scmp.lt.s32.totalorder %s172_s7, %s172_s7 }
  0x2b   :  { %v54_v6 = vmul.f32 1.442695, %v52_v4  ;;  %v56_v7 = vmul.f32 1.442695, %v53_v5 }
  0x2c   :  { %p179_p5 = por %p178_p4, %p177_p3 }
  0x2d   :  { %116 = vpow2.f32 %v54_v6 }
  0x2e   :  { %118 = vpow2.f32 %v56_v7  ;;  %p180_p6 = pnand %p179_p5, %p173_p2 }
  0x37   :  { %v117_v8 = vpop.eup %116 }
  0x38   :  { %v119_v9 = vpop.eup %118  ;;  %v58_v10 = vadd.f32 1.0, %v117_v8  ;;  %v61_v12 = vmul.f32 -0.5, %v117_v8  ;;  %v64_v19 = vand.u32 2147483647, %v117_v8 }
  0x39   :  { %v67_v11 = vadd.f32 1.0, %v119_v9  ;;  %v70_v13 = vmul.f32 -0.5, %v119_v9  ;;  %v73_v23 = vand.u32 2147483647, %v119_v9 }
  0x3a   :  { %120 = vlog2.f32 %v58_v10  ;;  %v62_v16 = vadd.f32 1.0, %v61_v12  ;;  %vm65_vm0 = vcmp.lt.f32.partialorder %v64_v19, 0.0004427343 }
  0x3b   :  { %122 = vlog2.f32 %v67_v11  ;;  %v71_v20 = vadd.f32 1.0, %v70_v13  ;;  %vm74_vm1 = vcmp.lt.f32.partialorder %v73_v23, 0.0004427343 }
  0x3c   :  { %v63_v24 = vmul.f32 %v117_v8, %v62_v16 }
  0x3d   :  { %v72_v27 = vmul.f32 %v119_v9, %v71_v20 }
  0x44   :  { %v121_v25 = vpop.eup %120 }
  0x45   :  { %v123_v28 = vpop.eup %122  ;;  %v60_v30 = vmul.f32 0.6931472, %v121_v25 }
  0x46   :  { %v69_v31 = vmul.f32 0.6931472, %v123_v28 }
  0x47   :  { %v66_v32 = vsel %vm65_vm0, %v63_v24, %v60_v30 }
  0x48   :  { %v75_v33 = vsel %vm74_vm1, %v72_v27, %v69_v31  ;;  %v76_v34 = vadd.f32 %v66_v32, %v48_v26 }
  0x49   :  { %v77_v35 = vadd.f32 %v75_v33, %v49_v29 }
  0x4a   :  { %v78_v36 = vsub.f32 0.0, %v76_v34 }
  0x4b   :  { %v79_v37 = vsub.f32 0.0, %v77_v35 }
  0x4c   :  { %v80_v38 = vmul.f32 1.442695, %v78_v36 }
  0x4d   :  { %v82_v39 = vmul.f32 1.442695, %v79_v37 }
  0x4e   :  { %124 = vpow2.f32 %v80_v38 }
  0x4f   :  { %126 = vpow2.f32 %v82_v39 }
  0x58   :  { %v125_v40 = vpop.eup %124 }
  0x59   :  { %v127_v41 = vpop.eup %126  ;;  %v84_v42 = vsub.f32 1.0, %v125_v40 }
  0x5a   :  { %v85_v43 = vsub.f32 1.0, %v127_v41 }
  0x5b   :  { %v86_v44 = vmul.f32 %v84_v42, %v84_v42 }
  0x5c   :  { %v87_v45 = vmul.f32 %v85_v43, %v85_v43 }
  0x5d   :  { %v88_v46 = vmul.f32 0.25, %v86_v44 }
  0x5e   :  { %v89_v47 = vmul.f32 0.25, %v87_v45 }
  0x5f   :  { %v90_v48 = vmul.f32 %v88_v46, %v76_v34 }
  0x60   :  { %v91_v49 = vmul.f32 %v89_v47, %v77_v35 }
  0x62   :  { %v92_v50 = vadd.f32 %v91_v49, %v90_v48 }
  0x64   :  { %94 = vst [vmem:[#allocation7] sm:$0xff] %v92_v50 }
  0x65   :  { %183 = shalt.err (!%p180_p6)
}
  0x66   :  { %s184_s10 = scalar_lea.hbm %s258_s2, 128 }
  0x67   :  { %p185_p7 = scmp.ne.s32.totalorder %s258_s2, %s184_s10  ;;  %p188_p8 = scmp.lt.u32.totalorder %s184_s10, %s258_s2 }
  0x69   :  { %p190_p9 = pnand %p188_p8, %p185_p7 }
  0x6b   :  { %193 = shalt.err (!%p190_p9)
}
  0x6c   :  { %104 = dma.vmem_to_hbm [thread:$0]  %s102_s6, 128, %s258_s2, [#allocation4]  }
  0x6d   :  { %198 = dma.done.wait [#allocation4], 128  }
  0x6e   :  { %199 = vsyncadd [#allocation4], 4294967168 }
  0x6f   :  { %108 = vsyncpa [#allocation3], 1 }
  0x70   :  { %109 = vsyncpa [#allocation6], 1 }
  0x71   :  { %110 = vsyncpa [#allocation4], 1 }

</bundles_post_ra>
